<compile_context>
chip_gen: v7x
topology: tpu7x:2x2x1
jax: 0.10.0
libtpu: 0.0.40
codegen_flags: <defaults>
</compile_context>

<pallas_src>
import functools

import jax
import jax.numpy as jnp
import numpy as np
from jax import lax
from jax.experimental import pallas as pl
from jax.experimental.pallas import tpu as pltpu


def _round_up(v, m):
    return (v + m - 1) // m * m


def _vmem_limit(need_bytes):
    # Actual requirement with 2x headroom, clamped to a range that is valid on
    # every generation (v7x has only 64 MiB physical VMEM per TensorCore).
    return int(min(48 * 1024 * 1024, max(16 * 1024 * 1024, 2 * need_bytes)))


# ---------------------------------------------------------------------------
# Kernel 1: fused projections
#   qkv = x @ Wqkv^T ;  qs = q * C**-0.5 ;  y2 = k1 @ Wf_k^T + x @ Wf_x^T + b
# ---------------------------------------------------------------------------
def _proj_kernel(x_ref, wqkv_ref, wfk_ref, wfx_ref, bf_ref,
                 qs_ref, k1_ref, v_ref, y2_ref, *, scale):
    Cp = x_ref.shape[2]
    x = x_ref[0]                                                   # (tr, Cp)
    # Single fused (tr,Cp)@(Cp,3Cp) MXU matmul; weights are pre-transposed in
    # the wrapper, so no in-kernel transposes.
    qkv = jnp.dot(x, wqkv_ref[...], preferred_element_type=jnp.float32)
    k1 = qkv[:, Cp:2 * Cp]
    # Fold the attention scale into q: O(N*C) instead of O(N*N).
    qs_ref[0] = (qkv[:, :Cp] * scale).astype(qs_ref.dtype)
    k1_ref[0] = k1.astype(k1_ref.dtype)
    v_ref[0] = qkv[:, 2 * Cp:].astype(v_ref.dtype)
    # fusion(concat([k1, x], -1)) == k1 @ Wf_k^T + x @ Wf_x^T + b_f
    y2_ref[0] = (jnp.dot(k1, wfk_ref[...], preferred_element_type=jnp.float32)
                 + jnp.dot(x, wfx_ref[...], preferred_element_type=jnp.float32)
                 + bf_ref[...]).astype(y2_ref.dtype)


# ---------------------------------------------------------------------------
# Kernel 2: flash-style attention   out = k1 + softmax(qs @ y2^T) @ v
# ---------------------------------------------------------------------------
def _attn_kernel(qs_ref, k1_ref, y2_ref, v_ref, o_ref,
                 m_s, l_s, acc_s, *, n_real, need_mask):
    kv = pl.program_id(2)

    @pl.when(kv == 0)
    def _():
        m_s[...] = jnp.full_like(m_s, -jnp.inf)
        l_s[...] = jnp.zeros_like(l_s)
        acc_s[...] = jnp.zeros_like(acc_s)

    q = qs_ref[0]                                                  # (tq, Cp)
    y2 = y2_ref[0]                                                 # (tk, Cp)
    # scores via contraction dims (no materialized transpose of y2).
    s = lax.dot_general(q, y2, dimension_numbers=(((1,), (1,)), ((), ())),
                        preferred_element_type=jnp.float32)        # (tq, tk)

    if need_mask:
        # Mask zero-padded key rows (exact). Padding < tile, so every key tile
        # keeps at least one real key and the online softmax never sees an
        # all -inf row.
        tk = y2_ref.shape[1]
        col = kv * tk + lax.broadcasted_iota(jnp.int32, s.shape, 1)
        s = jnp.where(col < n_real, s, -jnp.inf)

    m_new = jnp.maximum(m_s[...], jnp.max(s, axis=-1, keepdims=True))
    alpha = jnp.exp(m_s[...] - m_new)
    p = jnp.exp(s - m_new)
    l_s[...] = alpha * l_s[...] + jnp.sum(p, axis=-1, keepdims=True)
    acc_s[...] = alpha * acc_s[...] + jnp.dot(
        p.astype(v_ref.dtype), v_ref[0], preferred_element_type=jnp.float32)
    m_s[...] = m_new

    @pl.when(kv == pl.num_programs(2) - 1)
    def _():
        # Exact reciprocal for validation; approx=True (EUP slot) in perf builds.
        inv_l = pl.reciprocal(l_s[...], approx=False)
        out = k1_ref[0].astype(jnp.float32) + acc_s[...] * inv_l
        o_ref[0] = out.astype(o_ref.dtype)


# ---------------------------------------------------------------------------
# Wrapper
# ---------------------------------------------------------------------------
def contextual_fusion_attention(x, w_qkv, w_fusion, b_fusion, *, use_bf16=False):
    """x: (B, N, C); w_qkv: (3C, C); w_fusion: (C, 2C); b_fusion: (C,)."""
    B, N, C = x.shape
    scale = float(C) ** (-0.5)
    out_dtype = x.dtype
    f32 = jnp.float32
    proj_dtype = jnp.bfloat16 if use_bf16 else f32     # MXU operand dtype
    interm_dtype = jnp.bfloat16 if use_bf16 else f32   # qs/k1/v/y2 storage

    # Lane-aligned channel padding (exact: padded channels of q/k1/v/y2 are 0).
    Cp = _round_up(C, 128)
    # Query/key tile: 256 fills the 256-wide MXU on v6e/v7x and keeps the live
    # (tq, tk) score tile small; for short sequences use the whole (padded) N.
    tq = 256 if N >= 256 else _round_up(N, 8)
    tk = tq
    Np = _round_up(N, tq)
    nqt = Np // tq
    nkt = Np // tk
    need_mask = Np != N

    x_p = jnp.pad(x, ((0, 0), (0, Np - N), (0, Cp - C))).astype(proj_dtype)

    def _pad2(a, rows, cols):
        return jnp.pad(a, ((0, rows - a.shape[0]), (0, cols - a.shape[1])))

    # Pre-transpose + channel-pad weights once in XLA (outside the kernels).
    wq = w_qkv.astype(proj_dtype)
    wf = w_fusion.astype(proj_dtype)
    wqkv_t = jnp.concatenate(
        [_pad2(wq[j * C:(j + 1) * C, :].T, Cp, Cp) for j in range(3)], axis=1)
    wfk_t = _pad2(wf[:, :C].T, Cp, Cp)                 # multiplies k1
    wfx_t = _pad2(wf[:, C:].T, Cp, Cp)                 # multiplies x
    b_f = _pad2(b_fusion.astype(f32)[None, :], 1, Cp)  # (1, Cp), f32 add

    p_it = jnp.dtype(proj_dtype).itemsize
    i_it = jnp.dtype(interm_dtype).itemsize
    o_it = jnp.dtype(out_dtype).itemsize

    # ---------------- projection pallas_call ----------------
    proj_need = (2 * tq * Cp * p_it                                # x (dbl buf)
                 + 2 * (3 * Cp * Cp + 2 * Cp * Cp + Cp) * p_it     # weights
                 + 2 * 4 * tq * Cp * i_it                          # 4 outputs
                 + 4 * tq * 3 * Cp + 4 * tq * Cp)                  # f32 temps
    proj_cost = pl.CostEstimate(
        flops=B * Np * (2 * Cp * 3 * Cp + 4 * Cp * Cp),
        transcendentals=0,
        bytes_accessed=(x_p.size * p_it
                        + (wqkv_t.size + wfk_t.size + wfx_t.size) * p_it
                        + b_f.size * 4 + 4 * B * Np * Cp * i_it))

    qs, k1, v, y2 = pl.pallas_call(
        functools.partial(_proj_kernel, scale=scale),
        out_shape=tuple(jax.ShapeDtypeStruct((B, Np, Cp), interm_dtype)
                        for _ in range(4)),
        grid_spec=pltpu.PrefetchScalarGridSpec(
            num_scalar_prefetch=0,
            grid=(B, nqt),
            in_specs=[
                pl.BlockSpec((1, tq, Cp), lambda b, r: (b, r, 0)),   # x
                pl.BlockSpec((Cp, 3 * Cp), lambda b, r: (0, 0)),     # Wqkv^T
                pl.BlockSpec((Cp, Cp), lambda b, r: (0, 0)),         # Wf_k^T
                pl.BlockSpec((Cp, Cp), lambda b, r: (0, 0)),         # Wf_x^T
                pl.BlockSpec((1, Cp), lambda b, r: (0, 0)),          # b_f
            ],
            out_specs=tuple(
                pl.BlockSpec((1, tq, Cp), lambda b, r: (b, r, 0))
                for _ in range(4)),
        ),
        compiler_params=pltpu.CompilerParams(
            dimension_semantics=("parallel", "parallel"),
            vmem_limit_bytes=_vmem_limit(proj_need)),
        cost_estimate=proj_cost,
    )(x_p, wqkv_t, wfk_t, wfx_t, b_f)

    # ---------------- attention pallas_call ----------------
    attn_need = (2 * 2 * tq * Cp * i_it                  # qs, k1 (dbl buf)
                 + 2 * 2 * tk * Cp * i_it                # y2, v  (dbl buf)
                 + 2 * tq * Cp * o_it                    # out    (dbl buf)
                 + (tq * Cp + 2 * tq) * 4                # acc, m, l scratch
                 + 2 * tq * tk * 4)                      # score temporaries
    attn_cost = pl.CostEstimate(
        flops=4 * B * Np * Np * Cp,
        transcendentals=B * Np * Np,
        bytes_accessed=4 * B * Np * Cp * i_it + B * Np * Cp * o_it)

    out = pl.pallas_call(
        functools.partial(_attn_kernel, n_real=N, need_mask=need_mask),
        out_shape=jax.ShapeDtypeStruct((B, Np, Cp), out_dtype),
        grid_spec=pltpu.PrefetchScalarGridSpec(
            num_scalar_prefetch=0,
            grid=(B, nqt, nkt),
            in_specs=[
                pl.BlockSpec((1, tq, Cp), lambda b, t, k: (b, t, 0)),   # qs
                pl.BlockSpec((1, tq, Cp), lambda b, t, k: (b, t, 0)),   # k1
                pl.BlockSpec((1, tk, Cp), lambda b, t, k: (b, k, 0)),   # y2
                pl.BlockSpec((1, tk, Cp), lambda b, t, k: (b, k, 0)),   # v
            ],
            out_specs=pl.BlockSpec((1, tq, Cp), lambda b, t, k: (b, t, 0)),
            scratch_shapes=[pltpu.VMEM((tq, 1), f32),    # running max m
                            pltpu.VMEM((tq, 1), f32),    # running sum l
                            pltpu.VMEM((tq, Cp), f32)],  # output accumulator
        ),
        compiler_params=pltpu.CompilerParams(
            dimension_semantics=("parallel", "parallel", "arbitrary"),
            vmem_limit_bytes=_vmem_limit(attn_need)),
        cost_estimate=attn_cost,
    )(qs, k1, y2, v)

    return out[:, :N, :C]


# ---------------------------------------------------------------------------
# Pure-JAX reference for validation
# ---------------------------------------------------------------------------
def _reference(x, w_qkv, w_fusion, b_fusion):
    B, N, C = x.shape
    qkv = jnp.einsum("bnc,oc->bno", x, w_qkv)
    q, k1, v = qkv[..., :C], qkv[..., C:2 * C], qkv[..., 2 * C:]
    y1 = jnp.concatenate([k1, x], axis=-1)
    y2 = jnp.einsum("bnd,od->bno", y1, w_fusion) + b_fusion
    att = jnp.einsum("bnc,bmc->bnm", q, y2) * (C ** -0.5)
    att = jax.nn.softmax(att, axis=-1)
    k2 = jnp.einsum("bnm,bmc->bnc", att, v)
    return k1 + k2


if __name__ == "__main__":
    B, N, C = 2, 8, 32
    key = jax.random.PRNGKey(0)
    kx, kw1, kw2, kw3 = jax.random.split(key, 4)

    x = jax.random.normal(kx, (B, N, C), dtype=jnp.float32)
    w_qkv = 0.05 * jax.random.normal(kw1, (3 * C, C), dtype=jnp.float32)
    w_fusion = 0.05 * jax.random.normal(kw2, (C, 2 * C), dtype=jnp.float32)
    b_fusion = 0.05 * jax.random.normal(kw3, (C,), dtype=jnp.float32)

    out = contextual_fusion_attention(x, w_qkv, w_fusion, b_fusion)
    out = jax.block_until_ready(out)

    ref = _reference(x, w_qkv, w_fusion, b_fusion)
    np.testing.assert_allclose(np.asarray(out), np.asarray(ref),
                               rtol=1e-4, atol=1e-4)
    print("KERNEL_OK")
</pallas_src>

<mosaic_0001>
module attributes {stable_mosaic.version = 11 : i64} {
  func.func @_proj_kernel(%arg0: i32, %arg1: i32, %arg2: memref<1x8x128xf32, #tpu.memory_space<vmem>>, %arg3: memref<128x384xf32, #tpu.memory_space<vmem>>, %arg4: memref<128x128xf32, #tpu.memory_space<vmem>>, %arg5: memref<128x128xf32, #tpu.memory_space<vmem>>, %arg6: memref<1x128xf32, #tpu.memory_space<vmem>>, %arg7: memref<1x8x128xf32, #tpu.memory_space<vmem>>, %arg8: memref<1x8x128xf32, #tpu.memory_space<vmem>>, %arg9: memref<1x8x128xf32, #tpu.memory_space<vmem>>, %arg10: memref<1x8x128xf32, #tpu.memory_space<vmem>>) attributes {dimension_semantics = [#tpu.dimension_semantics<parallel>, #tpu.dimension_semantics<parallel>], iteration_bounds = array<i64: 2, 1>, scalar_prefetch = 0 : i64, scratch_operands = 0 : i64, tpu.core_type = #tpu.core_type<tc>, window_params = [{transform_indices = @transform_0, window_bounds = array<i64: 1, 8, 128>}, {pipeline_mode = #tpu.pipeline_mode<synchronous>, transform_indices = @transform_1, window_bounds = array<i64: 128, 384>}, {pipeline_mode = #tpu.pipeline_mode<synchronous>, transform_indices = @transform_2, window_bounds = array<i64: 128, 128>}, {pipeline_mode = #tpu.pipeline_mode<synchronous>, transform_indices = @transform_3, window_bounds = array<i64: 128, 128>}, {pipeline_mode = #tpu.pipeline_mode<synchronous>, transform_indices = @transform_4, window_bounds = array<i64: 1, 128>}, {transform_indices = @transform_5, window_bounds = array<i64: 1, 8, 128>}, {transform_indices = @transform_6, window_bounds = array<i64: 1, 8, 128>}, {transform_indices = @transform_7, window_bounds = array<i64: 1, 8, 128>}, {transform_indices = @transform_8, window_bounds = array<i64: 1, 8, 128>}]} {
    %c0 = arith.constant 0 : index
    %c0_0 = arith.constant 0 : index
    %c0_1 = arith.constant 0 : index
    %0 = vector.load %arg2[%c0, %c0_0, %c0_1] : memref<1x8x128xf32, #tpu.memory_space<vmem>>, vector<1x8x128xf32>
    %1 = vector.shape_cast %0 : vector<1x8x128xf32> to vector<8x128xf32>
    %c0_2 = arith.constant 0 : index
    %c0_3 = arith.constant 0 : index
    %2 = vector.load %arg3[%c0_2, %c0_3] : memref<128x384xf32, #tpu.memory_space<vmem>>, vector<128x384xf32>
    %cst = arith.constant dense<0.000000e+00> : vector<8x384xf32>
    %3 = tpu.matmul %1, %2, %cst {dimension_numbers = #tpu.dot_dimension_numbers<[1], [0], [0], [1], [0, 0, 1, 1], [], []>} : vector<8x128xf32>, vector<128x384xf32>, vector<8x384xf32> -> vector<8x384xf32>
    %4 = vector.extract_strided_slice %3 {offsets = [0, 128], sizes = [8, 128], strides = [1, 1]} : vector<8x384xf32> to vector<8x128xf32>
    %5 = vector.extract_strided_slice %3 {offsets = [0, 0], sizes = [8, 128], strides = [1, 1]} : vector<8x384xf32> to vector<8x128xf32>
    %cst_4 = arith.constant 0.176776692 : f32
    %6 = vector.broadcast %cst_4 : f32 to vector<8x128xf32>
    %7 = arith.mulf %5, %6 : vector<8x128xf32>
    %c0_5 = arith.constant 0 : index
    %c0_6 = arith.constant 0 : index
    %c0_7 = arith.constant 0 : index
    %8 = vector.load %arg7[%c0_5, %c0_6, %c0_7] : memref<1x8x128xf32, #tpu.memory_space<vmem>>, vector<1x8x128xf32>
    %9 = vector.shape_cast %8 : vector<1x8x128xf32> to vector<8x128xf32>
    %10 = vector.shape_cast %7 : vector<8x128xf32> to vector<1x8x128xf32>
    tpu.vector_store %arg7[%c0_5, %c0_6, %c0_7], %10 {strides = array<i32>} : memref<1x8x128xf32, #tpu.memory_space<vmem>>, vector<1x8x128xf32>,
    %c0_8 = arith.constant 0 : index
    %c0_9 = arith.constant 0 : index
    %c0_10 = arith.constant 0 : index
    %11 = vector.load %arg8[%c0_8, %c0_9, %c0_10] : memref<1x8x128xf32, #tpu.memory_space<vmem>>, vector<1x8x128xf32>
    %12 = vector.shape_cast %11 : vector<1x8x128xf32> to vector<8x128xf32>
    %13 = vector.shape_cast %4 : vector<8x128xf32> to vector<1x8x128xf32>
    tpu.vector_store %arg8[%c0_8, %c0_9, %c0_10], %13 {strides = array<i32>} : memref<1x8x128xf32, #tpu.memory_space<vmem>>, vector<1x8x128xf32>,
    %14 = vector.extract_strided_slice %3 {offsets = [0, 256], sizes = [8, 128], strides = [1, 1]} : vector<8x384xf32> to vector<8x128xf32>
    %c0_11 = arith.constant 0 : index
    %c0_12 = arith.constant 0 : index
    %c0_13 = arith.constant 0 : index
    %15 = vector.load %arg9[%c0_11, %c0_12, %c0_13] : memref<1x8x128xf32, #tpu.memory_space<vmem>>, vector<1x8x128xf32>
    %16 = vector.shape_cast %15 : vector<1x8x128xf32> to vector<8x128xf32>
    %17 = vector.shape_cast %14 : vector<8x128xf32> to vector<1x8x128xf32>
    tpu.vector_store %arg9[%c0_11, %c0_12, %c0_13], %17 {strides = array<i32>} : memref<1x8x128xf32, #tpu.memory_space<vmem>>, vector<1x8x128xf32>,
    %c0_14 = arith.constant 0 : index
    %c0_15 = arith.constant 0 : index
    %18 = vector.load %arg4[%c0_14, %c0_15] : memref<128x128xf32, #tpu.memory_space<vmem>>, vector<128x128xf32>
    %cst_16 = arith.constant dense<0.000000e+00> : vector<8x128xf32>
    %19 = tpu.matmul %4, %18, %cst_16 {dimension_numbers = #tpu.dot_dimension_numbers<[1], [0], [0], [1], [0, 0, 1, 1], [], []>} : vector<8x128xf32>, vector<128x128xf32>, vector<8x128xf32> -> vector<8x128xf32>
    %c0_17 = arith.constant 0 : index
    %c0_18 = arith.constant 0 : index
    %20 = vector.load %arg5[%c0_17, %c0_18] : memref<128x128xf32, #tpu.memory_space<vmem>>, vector<128x128xf32>
    %cst_19 = arith.constant dense<0.000000e+00> : vector<8x128xf32>
    %21 = tpu.matmul %1, %20, %cst_19 {dimension_numbers = #tpu.dot_dimension_numbers<[1], [0], [0], [1], [0, 0, 1, 1], [], []>} : vector<8x128xf32>, vector<128x128xf32>, vector<8x128xf32> -> vector<8x128xf32>
    %22 = arith.addf %19, %21 : vector<8x128xf32>
    %c0_20 = arith.constant 0 : index
    %c0_21 = arith.constant 0 : index
    %23 = vector.load %arg6[%c0_20, %c0_21] : memref<1x128xf32, #tpu.memory_space<vmem>>, vector<1x128xf32>
    %24 = vector.broadcast %23 : vector<1x128xf32> to vector<8x128xf32>
    %25 = arith.addf %22, %24 : vector<8x128xf32>
    %c0_22 = arith.constant 0 : index
    %c0_23 = arith.constant 0 : index
    %c0_24 = arith.constant 0 : index
    %26 = vector.load %arg10[%c0_22, %c0_23, %c0_24] : memref<1x8x128xf32, #tpu.memory_space<vmem>>, vector<1x8x128xf32>
    %27 = vector.shape_cast %26 : vector<1x8x128xf32> to vector<8x128xf32>
    %28 = vector.shape_cast %25 : vector<8x128xf32> to vector<1x8x128xf32>
    tpu.vector_store %arg10[%c0_22, %c0_23, %c0_24], %28 {strides = array<i32>} : memref<1x8x128xf32, #tpu.memory_space<vmem>>, vector<1x8x128xf32>,
    return
  }
  func.func @transform_0(%arg0: i32, %arg1: i32) -> (i32, i32, i32) {
    %c0_i32 = arith.constant 0 : i32
    %c0_i32_0 = arith.constant 0 : i32
    return %arg0, %arg1, %c0_i32 : i32, i32, i32
  }
  func.func @transform_1(%arg0: i32, %arg1: i32) -> (i32, i32) {
    %c0_i32 = arith.constant 0 : i32
    %c0_i32_0 = arith.constant 0 : i32
    %c0_i32_1 = arith.constant 0 : i32
    return %c0_i32, %c0_i32_0 : i32, i32
  }
  func.func @transform_2(%arg0: i32, %arg1: i32) -> (i32, i32) {
    %c0_i32 = arith.constant 0 : i32
    %c0_i32_0 = arith.constant 0 : i32
    %c0_i32_1 = arith.constant 0 : i32
    return %c0_i32, %c0_i32_0 : i32, i32
  }
  func.func @transform_3(%arg0: i32, %arg1: i32) -> (i32, i32) {
    %c0_i32 = arith.constant 0 : i32
    %c0_i32_0 = arith.constant 0 : i32
    %c0_i32_1 = arith.constant 0 : i32
    return %c0_i32, %c0_i32_0 : i32, i32
  }
  func.func @transform_4(%arg0: i32, %arg1: i32) -> (i32, i32) {
    %c0_i32 = arith.constant 0 : i32
    %c0_i32_0 = arith.constant 0 : i32
    %c0_i32_1 = arith.constant 0 : i32
    return %c0_i32, %c0_i32_0 : i32, i32
  }
  func.func @transform_5(%arg0: i32, %arg1: i32) -> (i32, i32, i32) {
    %c0_i32 = arith.constant 0 : i32
    %c0_i32_0 = arith.constant 0 : i32
    return %arg0, %arg1, %c0_i32 : i32, i32, i32
  }
  func.func @transform_6(%arg0: i32, %arg1: i32) -> (i32, i32, i32) {
    %c0_i32 = arith.constant 0 : i32
    %c0_i32_0 = arith.constant 0 : i32
    return %arg0, %arg1, %c0_i32 : i32, i32, i32
  }
  func.func @transform_7(%arg0: i32, %arg1: i32) -> (i32, i32, i32) {
    %c0_i32 = arith.constant 0 : i32
    %c0_i32_0 = arith.constant 0 : i32
    return %arg0, %arg1, %c0_i32 : i32, i32, i32
  }
  func.func @transform_8(%arg0: i32, %arg1: i32) -> (i32, i32, i32) {
    %c0_i32 = arith.constant 0 : i32
    %c0_i32_0 = arith.constant 0 : i32
    return %arg0, %arg1, %c0_i32 : i32, i32, i32
  }
}

</mosaic_0001>

<bundles_post_ra>
// kernel: tpu_custom_call.1
= control target key start
LH: loop header
LB: loop body
LE: loop exit
PB: predicated region body
PF: predicated region fallthrough
CT: control target
= control target key end

     0   :  { %s2244_s0 = inlined_call_operand.hbm [shape: f32[2,8,128], index: 0, kind: input, shape index: {}]   ;;  %s2245_s1 = inlined_call_operand.hbm [shape: f32[128,384], index: 1, kind: input, shape index: {}]   ;;  %s2246_s2 = inlined_call_operand.hbm [shape: f32[128,128], index: 2, kind: input, shape index: {}]   ;;  %s2247_s3 = inlined_call_operand.hbm [shape: f32[128,128], index: 3, kind: input, shape index: {}]   ;;  %s2248_s4 = inlined_call_operand.vmem [shape: f32[1,128], index: 4, kind: input, shape index: {}]   ;;  %s2249_s5 = inlined_call_operand.hbm [shape: f32[2,8,128], index: 5, kind: output, shape index: {0}]   ;;  %s2250_s6 = inlined_call_operand.hbm [shape: f32[2,8,128], index: 6, kind: output, shape index: {1}]   ;;  %s2251_s7 = inlined_call_operand.hbm [shape: f32[2,8,128], index: 7, kind: output, shape index: {2}]   ;;  %s2252_s8 = inlined_call_operand.hbm [shape: f32[2,8,128], index: 8, kind: output, shape index: {3}]  }
   0x1   :  { %2261 = sst [smem:[#allocation24_spill]] %s2245_s1 }
   0x2   :  { %2262 = sst [smem:[#allocation25_spill]] %s2252_s8 }
   0x3   :  { %14 = vsyncpa [#allocation3], 0 }
   0x4   :  { %16 = vsyncpa [#allocation3 + $0x1], 0 }
   0x5   :  { %17 = vsyncpa [#allocation6], 0 }
   0x6   :  { %18 = vsyncpa [#allocation9], 0 }
   0x7   :  { %19 = vsyncpa [#allocation4], 0 }
   0x8   :  { %21 = vsyncpa [#allocation4 + $0x1], 0 }
   0x9   :  { %22 = vsyncpa [#allocation12], 0 }
   0xa   :  { %24 = vsyncpa [#allocation12 + $0x1], 0 }
   0xb   :  { %25 = vsyncpa [#allocation15], 0 }
   0xc   :  { %27 = vsyncpa [#allocation15 + $0x1], 0  ;;  %s1830_s27 = smov 0   ;;  %s1832_s28 = smov 0  }
   0xd   :  { %s1834_s29 = smov 0   ;;  %s1836_s30 = smov 0  }
   0xe   :  { %s1838_s9 = smov 0   ;;  %s1840_s10 = smov 0  }
   0xf LB: > { %2263 = sst [smem:[#allocation22_spill]] %s1748_s27  ;;  %s1861_s11 = sadd.s32 4294967295, %s1768_s10   ;;  %s1768_s10 = sphi %s1840_s10, %s33_s10   ;;  %s1764_s9 = sphi %s1838_s9, %s2292_s9   ;;  %s1760_s30 = sphi %s1836_s30, %s2291_s30   ;;  %s1756_s29 = sphi %s1834_s29, %s2290_s29   ;;  %s1752_s28 = sphi %s1832_s28, %s2289_s28   ;;  %s1748_s27 = sphi %s1830_s27, %s2288_s27  }
  0x10   : > { %s2254_s12 = sadd.s32 4294967294, %s1768_s10   ;;  %p67_p0 = scmp.ne.s32.totalorder %s1752_s28, %s1748_s27 }
  0x11   : > { %p2253_p1 = scmp.eq.s32.totalorder %s1861_s11, 0  ;;  %p183_p3 = scmp.eq.s32.totalorder %s2254_s12, 1 }
  0x12   : > { %p1070_p5 = scmp.ge.s32.totalorder %s1768_s10, 1  ;;  %p274_p7 = scmp.lt.s32.totalorder %s1768_s10, 3 }
  0x13   : > { %p1872_p4 = por %p2253_p1, %p67_p0  ;;  %p1877_p6 = por %p183_p3, %p67_p0 }
  0x14   : > { %p1882_p8 = pnand %p1070_p5, %p274_p7  ;;  %s1770_s16 = smov [#allocation5]  }
  0x15   : > { %s2264_s13 = scalar_select %p1872_p4, 1, 0 }
  0x16   : > { %s2265_s14 = scalar_select %p1877_p6, 1, 0 }
  0x17   : > { %s2267_s15 = scalar_select %p1882_p8, 1, 0 }
  0x18   : > { %2266 = sst [smem:[#allocation23_spill]] %s2265_s14  ;;  %s286_s17 = sshll.u32 %s1770_s16, 4  ;;  %s1886_s17 = int_to_ptr.vmem [resolvable:$true] %s286_s17 }
  0x19   : > { %p1379_p9 = pneg %p1882_p8  ;;  %s1771_s19 = smov [#allocation7]  }
  0x1a   : > { %s299_s20 = sshll.u32 %s1771_s19, 4  ;;  %s2269_s1 = sld [smem:[#allocation24_spill]]  ;;  %s1897_s20 = int_to_ptr.vmem [resolvable:$true] %s299_s20 }
  0x1b   : > { %p1893_p11 = pnand %p1379_p9, %p2253_p1 }
  0x1d   : > { %p1907_p13 = pneg %p1893_p11 }
  0x20   : > { %s1472_s23 = scalar_lea.hbm %s2269_s1, 6144 }
  0x21   : > { %p1473_p12 = scmp.ne.s32.totalorder %s2269_s1, %s1472_s23  ;;  %p1479_p5 = scmp.lt.u32.totalorder %s1472_s23, %s2269_s1 }
  0x23   : > { %p1475_p0 = pnand %p1907_p13, %p1473_p12 }
  0x25   : > { %p1476_p3 = pneg %p1475_p0 }
  0x27   : > { %p1481_p7 = pnand %p1479_p5, %p1476_p3 }
  0x29   : > { %1484 = shalt.err (!%p1481_p7)
}
  0x2a   : > { %s1485_s21 = scalar_lea.vmem %s1886_s17, 6144  ;;  %p1493_p2 = scmp.lt.s32.totalorder %s1886_s17, %s1886_s17 }
  0x2b   : > { %p1486_p9 = scmp.ne.s32.totalorder %s1886_s17, %s1485_s21  ;;  %p1494_p6 = scmp.lt.s32.totalorder %s1485_s21, %s1485_s21 }
  0x2d   : > { %p1488_p10 = pnand %p1486_p9, %p1907_p13  ;;  %p1495_p12 = por %p1494_p6, %p1493_p2 }
  0x2f   : > { %p1489_p1 = pneg %p1488_p10 }
  0x31   : > { %p1496_p0 = pnand %p1495_p12, %p1489_p1 }
  0x33   : > { %1499 = shalt.err (!%p1496_p0)
}
  0x34   : > { %s1772_s22 = smov 384   ;;  %s1773_s23 = smov 24  }
  0x35   : > { %1382 = dma.hbm_to_vmem [thread:$0]  (!%p1893_p11), %s2269_s1, 6144, %s1886_s17, [#allocation6], %s1772_s22, %s1772_s22, %s1773_s23  }
  0x36   : > { %s1500_s12 = scalar_lea.hbm %s2246_s2, 2048 }
  0x37   : > { %p1501_p2 = scmp.ne.s32.totalorder %s2246_s2, %s1500_s12  ;;  %p1507_p10 = scmp.lt.u32.totalorder %s1500_s12, %s2246_s2 }
  0x39   : > { %p1503_p1 = pnand %p1501_p2, %p1907_p13 }
  0x3b   : > { %p1504_p6 = pneg %p1503_p1 }
  0x3d   : > { %p1509_p3 = pnand %p1507_p10, %p1504_p6 }
  0x3f   : > { %1512 = shalt.err (!%p1509_p3)
}
  0x40   : > { %s1513_s17 = scalar_lea.vmem %s1897_s20, 2048  ;;  %p1521_p12 = scmp.lt.s32.totalorder %s1897_s20, %s1897_s20 }
  0x41   : > { %p1514_p5 = scmp.ne.s32.totalorder %s1897_s20, %s1513_s17  ;;  %p1522_p0 = scmp.lt.s32.totalorder %s1513_s17, %s1513_s17 }
  0x43   : > { %p1516_p7 = pnand %p1514_p5, %p1907_p13  ;;  %p1523_p2 = por %p1522_p0, %p1521_p12 }
  0x45   : > { %p1517_p9 = pneg %p1516_p7 }
  0x47   : > { %p1524_p1 = pnand %p1523_p2, %p1517_p9 }
  0x49   : > { %1527 = shalt.err (!%p1524_p1)
}
  0x4a   : > { %s1774_s27 = smov 128   ;;  %s1775_s8 = smov 8  }
  0x4b   : > { %1385 = dma.hbm_to_vmem [thread:$0]  (!%p1893_p11), %s2246_s2, 2048, %s1897_s20, [#allocation6], %s1774_s27, %s1774_s27, %s1775_s8  }
  0x4c   : > { %s1776_s22 = smov [#allocation8]   ;;  %s1528_s16 = scalar_lea.hbm %s2247_s3, 2048 }
  0x4d   : > { %s312_s23 = sshll.u32 %s1776_s22, 4  ;;  %p1529_p6 = scmp.ne.s32.totalorder %s2247_s3, %s1528_s16  ;;  %s313_s23 = int_to_ptr.vmem [resolvable:$true] %s312_s23 }
  0x4e   : > { %p1535_p5 = scmp.lt.u32.totalorder %s1528_s16, %s2247_s3 }
  0x4f   : > { %p1531_p10 = pnand %p1529_p6, %p1907_p13 }
  0x51   : > { %p1532_p3 = pneg %p1531_p10 }
  0x53   : > { %p1537_p7 = pnand %p1535_p5, %p1532_p3 }
  0x55   : > { %1540 = shalt.err (!%p1537_p7)
}
  0x56   : > { %s1541_s20 = scalar_lea.vmem %s313_s23, 2048  ;;  %p1549_p2 = scmp.lt.s32.totalorder %s313_s23, %s313_s23 }
  0x57   : > { %p1542_p9 = scmp.ne.s32.totalorder %s313_s23, %s1541_s20  ;;  %p1550_p1 = scmp.lt.s32.totalorder %s1541_s20, %s1541_s20 }
  0x59   : > { %p1544_p12 = pnand %p1542_p9, %p1907_p13  ;;  %p1551_p4 = por %p1550_p1, %p1549_p2 }
  0x5b   : > { %p1545_p0 = pneg %p1544_p12 }
  0x5d   : > { %p1552_p8 = pnand %p1551_p4, %p1545_p0 }
  0x5f   : > { %1555 = shalt.err (!%p1552_p8)
}
  0x60   : > { %1388 = dma.hbm_to_vmem [thread:$0]  (!%p1893_p11), %s2247_s3, 2048, %s313_s23, [#allocation9], %s1774_s27, %s1774_s27, %s1775_s8  }
  0x61   : > { %s45_s1 = sadd.s32 1, %s1764_s9  ;;  %s54_s26 = sadd.s32 1, %s1756_s29 }
  0x62   : > { %p47_p4 = scmp.ge.s32.totalorder %s45_s1, 2  ;;  %p61_p8 = scmp.ne.s32.totalorder %s1756_s29, %s1752_s28 }
  0x63   : > { %p62_p13 = scmp.eq.s32.totalorder %s1768_s10, 0  ;;  %p2272_p10 = scmp.eq.s32.totalorder %s1861_s11, 1 }
  0x64   : > { %s2294_s1 = smov (%p47_p4, %s45_s1), 0  ;;  %p1409_p11 = scmp.lt.s32.totalorder %s1768_s10, 2 }
  0x65   : > { %p1976_p6 = por %p62_p13, %p61_p8  ;;  %p1982_p3 = por %p2272_p10, %p61_p8 }
  0x66   : > { %s49_s24 = ssub.s32 %s1764_s9, %s2294_s1  ;;  %s329_s27 = sand.u32 1, %s1756_s29  }
  0x67   : > { %p52_p5 = scmp.eq.s32.totalorder %s49_s24, 0  ;;  %s1075_s8 = sshll.u32 %s329_s27, 3 }
  0x68   : > { %s1076_s25 = sshll.u32 %s1764_s9, 7  ;;  %s333_s17 = scalar_lea.vmem [#allocation2], %s1075_s8 }
  0x69   : > { %s1991_s23 = scalar_select %p52_p5, %s1756_s29, %s54_s26  }
  0x6a   : > { %s1997_s21 = scalar_lea.hbm %s2244_s0, %s1076_s25  ;;  %s341_s20 = sshll.u32 %s333_s17, 4  ;;  %s1999_s20 = int_to_ptr.vmem [resolvable:$true] %s341_s20 }
  0x6b   : > { %p2003_p7 = pnand %p1409_p11, %p1976_p6  ;;  %s330_s14 = scalar_lea.sflag [#allocation3], %s329_s27 }
  0x6c   : > { %s1556_s26 = scalar_lea.hbm %s1997_s21, 128  ;;  %s1561_s25 = scalar_lea.hbm %s2244_s0, 256 }
  0x6d   : > { %p1557_p9 = scmp.ne.s32.totalorder %s1997_s21, %s1556_s26  ;;  %p1558_p12 = pneg %p2003_p7 }
  0x6e   : > { %p1562_p1 = scmp.lt.u32.totalorder %s1997_s21, %s2244_s0  ;;  %p1563_p4 = scmp.lt.u32.totalorder %s1561_s25, %s1556_s26 }
  0x6f   : > { %p1559_p0 = pnand %p1558_p12, %p1557_p9  ;;  %p1565_p13 = scmp.lt.u32.totalorder %s1556_s26, %s1997_s21 }
  0x70   : > { %p1564_p8 = por %p1563_p4, %p1562_p1 }
  0x71   : > { %p1560_p2 = pneg %p1559_p0 }
  0x72   : > { %p1566_p6 = por %p1565_p13, %p1564_p8 }
  0x74   : > { %p1567_p10 = pnand %p1566_p6, %p1560_p2 }
  0x76   : > { %1570 = shalt.err (!%p1567_p10)
}
  0x77   : > { %s1571_s27 = scalar_lea.vmem %s1999_s20, 128  ;;  %s1777_s19 = smov [#allocation2]  }
  0x78   : > { %p1572_p11 = scmp.ne.s32.totalorder %s1999_s20, %s1571_s27  ;;  %s1576_s17 = sshll.u32 %s1777_s19, 4  ;;  %s1577_s17 = int_to_ptr.vmem [resolvable:$false] %s1576_s17 }
  0x79   : > { %s1578_s24 = scalar_lea.vmem %s1577_s17, 256  ;;  %p1579_p0 = scmp.lt.s32.totalorder %s1999_s20, %s1577_s17 }
  0x7a   : > { %p1574_p5 = pnand %p1572_p11, %p1558_p12  ;;  %p1580_p1 = scmp.lt.s32.totalorder %s1578_s24, %s1571_s27 }
  0x7c   : > { %p1575_p9 = pneg %p1574_p5  ;;  %p1581_p4 = por %p1580_p1, %p1579_p0 }
  0x7e   : > { %p1582_p8 = pnand %p1581_p4, %p1575_p9 }
  0x80   : > { %1585 = shalt.err (!%p1582_p8)
}
  0x81   : > { %1392 = dma.hbm_to_vmem [thread:$0]  (!%p2003_p7), %s1997_s21, 128, %s1999_s20, %s330_s14  }
  0x82   : > { %p2275_p2 = scmp.ne.s32.totalorder %s2267_s15, 0 }
  0x83   : > { %s2035_s26 = sand.u32 (!%p2275_p2), 1, %s1752_s28   ;;  %p2276_p12 = scmp.ne.s32.totalorder (!%p2275_p2), %s2264_s13, 0 }
  0x84   : > { %350 = sbr.rel (%p2275_p2) target bundleno = 624 (0x270), region = 40  ;;  %s2038_s8 = sshll.u32 (!%p2275_p2), %s2035_s26, 3 }
  0x85   : > { %s353_s25 = scalar_lea.sflag (!%p2275_p2), [#allocation3], %s2035_s26  ;;  %s356_s18 = scalar_lea.vmem (!%p2275_p2), [#allocation2], %s2038_s8 }
  0x8b   : > { %1723 = dma.done.wait (%p2276_p12), %s353_s25, 128  }
  0x8c   : > { %1725 = vsyncadd (%p2276_p12), %s353_s25, 4294967168  ;;  %p2277_p7 = scmp.eq.s32.totalorder %s1861_s11, 0 }
  0x8e   : > { %1727 = dma.done.wait (%p2277_p7), [#allocation6], 8192   ;;  %p2278_p13 = pmov %p2277_p7 }
  0x8f   : > { %p2279_p6 = pmov %p2277_p7 }
  0x90   : > { %1729 = vsyncadd (%p2278_p13), [#allocation6], 4294959104 }
  0x91   : > { %1731 = dma.done.wait (%p2279_p6), [#allocation9], 2048   ;;  %p2280_p10 = pmov %p2279_p6 }
  0x92   : > { %v1778_v0 = vmov 0.0   ;;  %v1779_v1 = vmov 0.0|0.0   ;;  %vm1780_vm0 = vmmov 0   ;;  %v418_v2 = vld [vmem:[#allocation5 + $0x8] sm:$0xff]  ;;  %v421_v3 = vld [vmem:[#allocation5 + $0x20] sm:$0xff]  ;;  %v420_v6 = vld [vmem:[#allocation5 + $0x18] sm:$0xff] }
  0x93   : > { %1733 = vsyncadd (%p2280_p10), [#allocation9], 4294965248  ;;  %529 = vmatprep.mubr.f32.mxu0 %v1778_v0  ;;  %1285 = vmatprep.subr.bf16.mxu1 %v1779_v1  ;;  %v417_v4 = vld [vmem:[#allocation5] sm:$0xff]  ;;  %v1253_v5 = vpack.c.bf16 %v421_v3, %v418_v2  ;;  %v424_v7 = vld [vmem:[#allocation5 + $0x38] sm:$0xff]  ;;  %s401_s13 = scalar_lea.vmem [#allocation11], %s2038_s8  ;;  %s2260_s15 = scalar_lea.vmem [#allocation10], %s2038_s8 }
  0x94   : > { %1180 = vmatprep.mubr.msk.f32.mxu1 %vm1780_vm0, %v1778_v0  ;;  %v427_v8 = vld [vmem:[#allocation5 + $0x50] sm:$0xff]  ;;  %v1255_v9 = vpack.c.bf16 %v420_v6, %v417_v4  ;;  %v426_v12 = vld [vmem:[#allocation5 + $0x48] sm:$0xff]  ;;  %v433_v14 = vld [vmem:[#allocation5 + $0x80] sm:$0xff]  ;;  %s408_s21 = scalar_lea.vmem [#allocation13], %s2038_s8  ;;  %s835_s20 = sshll.u32 %s401_s13, 4  ;;  %s2099_s20 = int_to_ptr.vmem [resolvable:$true] %s835_s20 }
  0x95   : > { %v1257_v10 = vpack.c.bf16 %v427_v8, %v424_v7  ;;  %v423_v11 = vld [vmem:[#allocation5 + $0x30] sm:$0xff]  ;;  %v430_v13 = vld [vmem:[#allocation5 + $0x68] sm:$0xff]  ;;  %1254 = vmatprep.subr.bf16.mxu0 %v1253_v5  ;;  %v429_v17 = vld [vmem:[#allocation5 + $0x60] sm:$0xff]  ;;  %s849_s12 = sshll.u32 %s408_s21, 4  ;;  %s796_s14 = sand.u32 1, %s1861_s11   ;;  %s2101_s12 = int_to_ptr.vmem [resolvable:$true] %s849_s12 }
  0x96   : > { %1256 = vmatpush1.bf16.msra.mxu0 %v1255_v9  ;;  %v1259_v15 = vpack.c.bf16 %v426_v12, %v423_v11  ;;  %v1261_v16 = vpack.c.bf16 %v433_v14, %v430_v13  ;;  %v432_v18 = vld [vmem:[#allocation5 + $0x78] sm:$0xff]  ;;  %v439_v20 = vld [vmem:[#allocation5 + $0xb0] sm:$0xff]  ;;  %v438_v24 = vld [vmem:[#allocation5 + $0xa8] sm:$0xff]  ;;  %s2105_s16 = sshll.u32 %s1760_s30, 7  ;;  %s2111_s24 = scalar_lea.sflag [#allocation12], %s796_s14 }
  0x97   : > { %1258 = vmatprep.subr.bf16.mxu0 %v1257_v10  ;;  %v436_v19 = vld [vmem:[#allocation5 + $0x98] sm:$0xff]  ;;  %v1263_v21 = vpack.c.bf16 %v432_v18, %v429_v17  ;;  %v435_v23 = vld [vmem:[#allocation5 + $0x90] sm:$0xff]  ;;  %v442_v25 = vld [vmem:[#allocation5 + $0xc8] sm:$0xff]  ;;  %s833_s17 = scalar_lea.hbm %s2250_s6, %s2105_s16  ;;  %s1586_s25 = scalar_lea.vmem %s2099_s20, 128 }
  0x98   : > { %v1265_v22 = vpack.c.bf16 %v439_v20, %v436_v19  ;;  %v445_v26 = vld [vmem:[#allocation5 + $0xe0] sm:$0xff]  ;;  %v419_v27 = vld [vmem:[#allocation5 + $0x10] sm:$0xff]  ;;  %v422_v28 = vld [vmem:[#allocation5 + $0x28] sm:$0xff]  ;;  %v1267_v30 = vpack.c.bf16 %v438_v24, %v435_v23  ;;  %p1587_p11 = scmp.ne.s32.totalorder %s2099_s20, %s1586_s25 }
  0x99   : > { %v425_v29 = vld [vmem:[#allocation5 + $0x40] sm:$0xff]  ;;  %v1286_v31 = vpack.c.bf16 %v422_v28, %v419_v27  ;;  %v428_v32 = vld [vmem:[#allocation5 + $0x58] sm:$0xff]  ;;  %v1269_v33 = vpack.c.bf16 %v445_v26, %v442_v25  ;;  %v451_v37 = vld [vmem:[#allocation5 + $0x110] sm:$0xff] }
  0x9a   : > { %1260 = vmatpush1.bf16.msra.mxu0 %v1259_v15  ;;  %v441_v34 = vld [vmem:[#allocation5 + $0xc0] sm:$0xff]  ;;  %v444_v35 = vld [vmem:[#allocation5 + $0xd8] sm:$0xff]  ;;  %v1289_v38 = vpack.c.bf16 %v428_v32, %v425_v29  ;;  %v431_v39 = vld [vmem:[#allocation5 + $0x70] sm:$0xff]  ;;  %p1588_p5 = pnand %p1587_p11, %p1982_p3 }
  0x9b   : > { %1262 = vmatprep.subr.bf16.mxu0 %v1261_v16  ;;  %v448_v36 = vld [vmem:[#allocation5 + $0xf8] sm:$0xff]  ;;  %1287 = vmatpush3.bf16.msra.mxu1 %v1286_v31  ;;  %v434_v40 = vld [vmem:[#allocation5 + $0x88] sm:$0xff]  ;;  %v1271_v41 = vpack.c.bf16 %v444_v35, %v441_v34  ;;  %v447_v43 = vld [vmem:[#allocation5 + $0xf0] sm:$0xff] }
  0x9c   : > { %1288 = vmatprep.subr.bf16.mxu1 %v1779_v1  ;;  %v1273_v42 = vpack.c.bf16 %v451_v37, %v448_v36  ;;  %v450_v44 = vld [vmem:[#allocation5 + $0x108] sm:$0xff]  ;;  %v457_v46 = vld [vmem:[#allocation5 + $0x140] sm:$0xff]  ;;  %v1292_v47 = vpack.c.bf16 %v434_v40, %v431_v39  ;;  %v440_v49 = vld [vmem:[#allocation5 + $0xb8] sm:$0xff]  ;;  %p1589_p9 = pneg %p1588_p5 }
  0x9d   : > { %v454_v45 = vld [vmem:[#allocation5 + $0x128] sm:$0xff]  ;;  %v437_v48 = vld [vmem:[#allocation5 + $0xa0] sm:$0xff]  ;;  %v1275_v50 = vpack.c.bf16 %v450_v44, %v447_v43  ;;  %v456_v53 = vld [vmem:[#allocation5 + $0x138] sm:$0xff] }
  0x9e   : > { %1264 = vmatpush1.bf16.msra.mxu0 %v1263_v21  ;;  %v1277_v51 = vpack.c.bf16 %v457_v46, %v454_v45  ;;  %v453_v52 = vld [vmem:[#allocation5 + $0x120] sm:$0xff]  ;;  %v460_v54 = vld [vmem:[#allocation5 + $0x158] sm:$0xff]  ;;  %v463_v55 = vld [vmem:[#allocation5 + $0x170] sm:$0xff]  ;;  %v1295_v56 = vpack.c.bf16 %v440_v49, %v437_v48 }
  0x9f   : > { %1266 = vmatprep.subr.bf16.mxu0 %v1265_v22  ;;  %1290 = vmatpush3.bf16.msra.mxu1 %v1289_v38  ;;  %v443_v57 = vld [vmem:[#allocation5 + $0xd0] sm:$0xff]  ;;  %v446_v58 = vld [vmem:[#allocation5 + $0xe8] sm:$0xff]  ;;  %v1279_v59 = vpack.c.bf16 %v456_v53, %v453_v52  ;;  %v1281_v60 = vpack.c.bf16 %v463_v55, %v460_v54  ;;  %v449_v2 = vld [vmem:[#allocation5 + $0x100] sm:$0xff] }
  0xa0   : > { %1291 = vmatprep.subr.bf16.mxu1 %v1779_v1  ;;  %v459_v61 = vld [vmem:[#allocation5 + $0x150] sm:$0xff]  ;;  %v462_v62 = vld [vmem:[#allocation5 + $0x168] sm:$0xff]  ;;  %v1298_v63 = vpack.c.bf16 %v446_v58, %v443_v57  ;;  %v452_v3 = vld [vmem:[#allocation5 + $0x118] sm:$0xff] }
  0xa1   : > { %v1283_v4 = vpack.c.bf16 %v462_v62, %v459_v61  ;;  %v626_v5 = vld [vmem:[#allocation8] sm:$0xff]  ;;  %v627_v6 = vld [vmem:[#allocation8 + $0x8] sm:$0xff]  ;;  %v1301_v7 = vpack.c.bf16 %v452_v3, %v449_v2  ;;  %v455_v8 = vld [vmem:[#allocation5 + $0x130] sm:$0xff] }
  0xa2   : > { %1268 = vmatpush1.bf16.msra.mxu0 %v1267_v30  ;;  %v458_v9 = vld [vmem:[#allocation5 + $0x148] sm:$0xff]  ;;  %v2065_v10 = vld [vmem:[%s356_s18] sm:$0xff]  ;;  %v1310_v11 = vpack.c.bf16 %v627_v6, %v626_v5  ;;  %v461_v15 = vld [vmem:[#allocation5 + $0x160] sm:$0xff]  ;;  %s1781_s18 = smov [#allocation11]  }
  0xa3   : > { %1270 = vmatprep.subr.bf16.mxu0 %v1269_v33  ;;  %1293 = vmatpush3.bf16.msra.mxu1 %v1292_v47  ;;  %v628_v12 = vld [vmem:[#allocation8 + $0x10] sm:$0xff]  ;;  %v629_v13 = vld [vmem:[#allocation8 + $0x18] sm:$0xff]  ;;  %v1304_v14 = vpack.c.bf16 %v458_v9, %v455_v8  ;;  %v630_v18 = vld [vmem:[#allocation8 + $0x20] sm:$0xff] }
  0xa4   : > { %1294 = vmatprep.subr.bf16.mxu1 %v1779_v1  ;;  %v464_v16 = vld [vmem:[#allocation5 + $0x178] sm:$0xff]  ;;  %v1313_v17 = vpack.c.bf16 %v629_v13, %v628_v12  ;;  %v631_v19 = vld [vmem:[#allocation8 + $0x28] sm:$0xff]  ;;  %v610_v21 = vld [vmem:[#allocation7] sm:$0xff] }
  0xa5   : > { %v1307_v20 = vpack.c.bf16 %v464_v16, %v461_v15  ;;  %v611_v22 = vld [vmem:[#allocation7 + $0x8] sm:$0xff]  ;;  %v1316_v23 = vpack.c.bf16 %v631_v19, %v630_v18  ;;  %v632_v24 = vld [vmem:[#allocation8 + $0x30] sm:$0xff]  ;;  %v633_v25 = vld [vmem:[#allocation8 + $0x38] sm:$0xff] }
  0xa6   : > { %1272 = vmatpush1.bf16.msra.mxu0 %v1271_v41  ;;  %v1334_v26 = vpack.c.bf16 %v611_v22, %v610_v21  ;;  %v612_v27 = vld [vmem:[#allocation7 + $0x10] sm:$0xff]  ;;  %v613_v28 = vld [vmem:[#allocation7 + $0x18] sm:$0xff]  ;;  %v1319_v29 = vpack.c.bf16 %v633_v25, %v632_v24  ;;  %v634_v30 = vld [vmem:[#allocation8 + $0x40] sm:$0xff] }
  0xa7   : > { %1274 = vmatprep.subr.bf16.mxu0 %v1273_v42  ;;  %1296 = vmatpush3.bf16.msra.mxu1 %v1295_v56  ;;  %v635_v31 = vld [vmem:[#allocation8 + $0x48] sm:$0xff]  ;;  %v1337_v32 = vpack.c.bf16 %v613_v28, %v612_v27  ;;  %v614_v33 = vld [vmem:[#allocation7 + $0x20] sm:$0xff]  ;;  %v636_v36 = vld [vmem:[#allocation8 + $0x50] sm:$0xff] }
  0xa8   : > { %1297 = vmatprep.subr.bf16.mxu1 %v1779_v1  ;;  %v615_v34 = vld [vmem:[#allocation7 + $0x28] sm:$0xff]  ;;  %v1322_v35 = vpack.c.bf16 %v635_v31, %v634_v30  ;;  %v637_v37 = vld [vmem:[#allocation8 + $0x58] sm:$0xff]  ;;  %v616_v39 = vld [vmem:[#allocation7 + $0x30] sm:$0xff] }
  0xa9   : > { %v1340_v38 = vpack.c.bf16 %v615_v34, %v614_v33  ;;  %v617_v40 = vld [vmem:[#allocation7 + $0x38] sm:$0xff]  ;;  %v1325_v41 = vpack.c.bf16 %v637_v37, %v636_v36  ;;  %v639_v42 = vld [vmem:[#allocation8 + $0x68] sm:$0xff]  ;;  %v618_v44 = vld [vmem:[#allocation7 + $0x40] sm:$0xff] }
  0xaa   : > { %1276 = vmatpush1.bf16.msra.mxu0 %v1275_v50  ;;  %v1343_v43 = vpack.c.bf16 %v617_v40, %v616_v39  ;;  %v619_v45 = vld [vmem:[#allocation7 + $0x48] sm:$0xff]  ;;  %v640_v47 = vld [vmem:[#allocation8 + $0x70] sm:$0xff]  ;;  %v641_v48 = vld [vmem:[#allocation8 + $0x78] sm:$0xff] }
  0xab   : > { %1278 = vmatprep.subr.bf16.mxu0 %v1277_v51  ;;  %1299 = vmatpush3.bf16.msra.mxu1 %v1298_v63  ;;  %v1346_v49 = vpack.c.bf16 %v619_v45, %v618_v44  ;;  %v620_v50 = vld [vmem:[#allocation7 + $0x50] sm:$0xff]  ;;  %v621_v51 = vld [vmem:[#allocation7 + $0x58] sm:$0xff]  ;;  %v1331_v52 = vpack.c.bf16 %v641_v48, %v640_v47  ;;  %v622_v54 = vld [vmem:[#allocation7 + $0x60] sm:$0xff] }
  0xac   : > { %1300 = vmatprep.subr.bf16.mxu1 %v1779_v1  ;;  %v1349_v53 = vpack.c.bf16 %v621_v51, %v620_v50  ;;  %v623_v55 = vld [vmem:[#allocation7 + $0x68] sm:$0xff]  ;;  %v624_v57 = vld [vmem:[#allocation7 + $0x70] sm:$0xff]  ;;  %v625_v58 = vld [vmem:[#allocation7 + $0x78] sm:$0xff] }
  0xad   : > { %v1352_v56 = vpack.c.bf16 %v623_v55, %v622_v54 }
  0xae   : > { %1280 = vmatpush1.bf16.msra.mxu0 %v1279_v59  ;;  %v1355_v59 = vpack.c.bf16 %v625_v58, %v624_v57 }
  0xaf   : > { %1282 = vmatprep.subr.bf16.mxu0 %v1281_v60  ;;  %1302 = vmatpush3.bf16.msra.mxu1 %v1301_v7 }
  0xb0   : > { %1303 = vmatprep.subr.bf16.mxu1 %v1779_v1 }
  0xb2   : > { %1284 = vmatpush1.bf16.msra.mxu0 %v1283_v4 }
  0xb3   : > { %1309 = vmatprep.subr.bf16.mxu0 %v1779_v1  ;;  %1305 = vmatpush3.bf16.msra.mxu1 %v1304_v14 }
  0xb4   : > { %1306 = vmatprep.subr.bf16.mxu1 %v1779_v1 }
  0xb5   : > { %530 = vmatmul.mubr.f32.vlgmr.msra.gmra.mrb[0].mxu0 %v2065_v10 }
  0xb6   : > { %1311 = vmatpush3.bf16.msra.mxu0 %v1310_v11  ;;  %1215 = vmatprep.mubr.msk.f32.mxu0 %vm1780_vm0, %v1778_v0 }
  0xb7   : > { %1312 = vmatprep.subr.bf16.mxu0 %v1779_v1  ;;  %1308 = vmatpush3.bf16.msra.mxu1 %v1307_v20 }
  0xb8   : > { %1333 = vmatprep.subr.bf16.mxu1 %v1779_v1 }
  0xba   : > { %1314 = vmatpush3.bf16.msra.mxu0 %v1313_v17  ;;  %1181 = vmatmul.mubr.f32.vlgmr.msra.gmra.mrb[0].mxu1 %v2065_v10 }
  0xbb   : > { %1315 = vmatprep.subr.bf16.mxu0 %v1779_v1  ;;  %1335 = vmatpush3.bf16.msra.mxu1 %v1334_v26 }
  0xbc   : > { %1250 = vmatprep.mubr.msk.f32.mxu1 %vm1780_vm0, %v1778_v0  ;;  %1336 = vmatprep.subr.bf16.mxu1 %v1779_v1  ;;  %v638_v0 = vld [vmem:[#allocation8 + $0x60] sm:$0xff] }
  0xbd   : > { %v1328_v46 = vpack.c.bf16 %v639_v42, %v638_v0 }
  0xbe   : > { %1317 = vmatpush3.bf16.msra.mxu0 %v1316_v23 }
  0xbf   : > { %1318 = vmatprep.subr.bf16.mxu0 %v1779_v1  ;;  %1338 = vmatpush3.bf16.msra.mxu1 %v1337_v32 }
  0xc0   : > { %1339 = vmatprep.subr.bf16.mxu1 %v1779_v1 }
  0xc2   : > { %1320 = vmatpush3.bf16.msra.mxu0 %v1319_v29 }
  0xc3   : > { %1321 = vmatprep.subr.bf16.mxu0 %v1779_v1  ;;  %1341 = vmatpush3.bf16.msra.mxu1 %v1340_v38 }
  0xc4   : > { %1342 = vmatprep.subr.bf16.mxu1 %v1779_v1 }
  0xc6   : > { %1323 = vmatpush3.bf16.msra.mxu0 %v1322_v35 }
  0xc7   : > { %1324 = vmatprep.subr.bf16.mxu0 %v1779_v1  ;;  %1344 = vmatpush3.bf16.msra.mxu1 %v1343_v43 }
  0xc8   : > { %1345 = vmatprep.subr.bf16.mxu1 %v1779_v1 }
  0xca   : > { %1326 = vmatpush3.bf16.msra.mxu0 %v1325_v41 }
  0xcb   : > { %1327 = vmatprep.subr.bf16.mxu0 %v1779_v1  ;;  %1347 = vmatpush3.bf16.msra.mxu1 %v1346_v49 }
  0xcc   : > { %1348 = vmatprep.subr.bf16.mxu1 %v1779_v1 }
  0xce   : > { %1329 = vmatpush3.bf16.msra.mxu0 %v1328_v46 }
  0xcf   : > { %1330 = vmatprep.subr.bf16.mxu0 %v1779_v1  ;;  %1350 = vmatpush3.bf16.msra.mxu1 %v1349_v53 }
  0xd0   : > { %1351 = vmatprep.subr.bf16.mxu1 %v1779_v1 }
  0xd2   : > { %1332 = vmatpush3.bf16.msra.mxu0 %v1331_v52 }
  0xd3   : > { %1353 = vmatpush3.bf16.msra.mxu1 %v1352_v56 }
  0xd4   : > { %1354 = vmatprep.subr.bf16.mxu1 %v1779_v1 }
  0xd5   : > { %1216 = vmatmul.mubr.f32.vlgmr.msra.gmra.mrb[2].mxu0 %v2065_v10 }
  0xd7   : > { %1356 = vmatpush3.bf16.msra.mxu1 %v1355_v59 }
 0x188   : > { %v531_v60 = vpop.f32.mrb[0].mxu0 }
 0x189   : > { %v606_v61 = vmul.f32 0.17677669, %v531_v60  ;;  %v533_v62 = vpop.f32.mrb[1].mxu0 }
 0x18a   : > { %608 = vst [vmem:[%s401_s13] sm:$0xff] %v533_v62  ;;  %1251 = vmatmul.mubr.f32.vlgmr.msra.gmra.mrb[2].mxu1 %v533_v62  ;;  %s1590_s13 = sshll.u32 %s1781_s18, 4  ;;  %s1591_s13 = int_to_ptr.vmem [resolvable:$false] %s1590_s13 }
 0x18b   : > { %607 = vst [vmem:[%s2260_s15] sm:$0xff] %v606_v61  ;;  %p1593_p0 = scmp.lt.s32.totalorder %s2099_s20, %s1591_s13 }
 0x18d   : > { %v602_v63 = vpop.f32.mrb[0].mxu1 }
 0x18e   : > { %609 = vst [vmem:[%s408_s21] sm:$0xff] %v602_v63  ;;  %v1182_v2 = vpop.f32.mrb[1].mxu1  ;;  %s1592_s21 = scalar_lea.vmem %s1591_s13, 256 }
 0x18f   : > { %p1594_p1 = scmp.lt.s32.totalorder %s1592_s21, %s1586_s25 }
 0x191   : > { %p1595_p4 = por %p1594_p1, %p1593_p0 }
 0x193   : > { %p1596_p8 = pnand %p1595_p4, %p1589_p9 }
 0x1a8   : > { %v2097_v3 = vpop.f32.mrb[2].mxu0 }
 0x1a9   : > { %v1217_v1 = vpop.f32.mrb[3].mxu0 }
 0x1aa   : > { %1599 = shalt.err (!%p1596_p8)
}
 0x1ab   : > { %s1600_s30 = scalar_lea.hbm %s833_s17, 128  ;;  %s1604_s27 = scalar_lea.hbm %s2250_s6, 256 }
 0x1ac   : > { %p1601_p2 = scmp.ne.s32.totalorder %s833_s17, %s1600_s30  ;;  %p1605_p13 = scmp.lt.u32.totalorder %s833_s17, %s2250_s6 }
 0x1ad   : > { %p1606_p6 = scmp.lt.u32.totalorder %s1604_s27, %s1600_s30  ;;  %p1608_p11 = scmp.lt.u32.totalorder %s1600_s30, %s833_s17 }
 0x1ae   : > { %p1602_p12 = pnand %p1601_p2, %p1982_p3 }
 0x1af   : > { %p1607_p10 = por %p1606_p6, %p1605_p13 }
 0x1b0   : > { %p1603_p7 = pneg %p1602_p12 }
 0x1b1   : > { %p1609_p5 = por %p1608_p11, %p1607_p10 }
 0x1b3   : > { %p1610_p9 = pnand %p1609_p5, %p1603_p7 }
 0x1b5   : > { %1613 = shalt.err (!%p1610_p9)
}
 0x1b6   : > { %1372 = dma.vmem_to_hbm [thread:$0]  (%p1982_p3), %s2099_s20, 128, %s833_s17, %s2111_s24  }
 0x1b7   : > { %s2134_s15 = scalar_lea.hbm %s2249_s5, %s2105_s16  ;;  %s2281_s13 = scalar_lea.vmem [#allocation10], %s2038_s8 }
 0x1b8   : > { %s821_s21 = sshll.u32 %s2281_s13, 4  ;;  %s2142_s14 = scalar_lea.hbm %s2251_s7, %s2105_s16  ;;  %s822_s21 = int_to_ptr.vmem [resolvable:$true] %s821_s21 }
 0x1b9   : > { %s792_s27 = scalar_lea.sflag [#allocation4], %s2035_s26  ;;  %s1614_s19 = scalar_lea.vmem %s822_s21, 128 }
 0x1ba   : > { %p1615_p0 = scmp.ne.s32.totalorder %s822_s21, %s1614_s19  ;;  %s1782_s20 = smov [#allocation10]  }
 0x1bb   : > { %s1618_s17 = sshll.u32 %s1782_s20, 4  ;;  %s1619_s17 = int_to_ptr.vmem [resolvable:$false] %s1618_s17 }
 0x1bc   : > { %p1616_p1 = pnand %p1615_p0, %p1982_p3  ;;  %s1620_s25 = scalar_lea.vmem %s1619_s17, 256 }
 0x1bd   : > { %p1621_p8 = scmp.lt.s32.totalorder %s822_s21, %s1619_s17  ;;  %p1622_p2 = scmp.lt.s32.totalorder %s1620_s25, %s1614_s19 }
 0x1be   : > { %p1617_p4 = pneg %p1616_p1 }
 0x1bf   : > { %p1623_p12 = por %p1622_p2, %p1621_p8 }
 0x1c1   : > { %p1624_p7 = pnand %p1623_p12, %p1617_p4 }
 0x1c3   : > { %1627 = shalt.err (!%p1624_p7)
}
 0x1c4   : > { %s1628_s18 = scalar_lea.hbm %s2134_s15, 128  ;;  %s1632_s11 = scalar_lea.hbm %s2249_s5, 256 }
 0x1c5   : > { %p1629_p13 = scmp.ne.s32.totalorder %s2134_s15, %s1628_s18  ;;  %p1633_p11 = scmp.lt.u32.totalorder %s2134_s15, %s2249_s5 }
 0x1c6   : > { %p1634_p5 = scmp.lt.u32.totalorder %s1632_s11, %s1628_s18  ;;  %p1636_p0 = scmp.lt.u32.totalorder %s1628_s18, %s2134_s15 }
 0x1c7   : > { %p1630_p6 = pnand %p1629_p13, %p1982_p3 }
 0x1c8   : > { %p1635_p9 = por %p1634_p5, %p1633_p11 }
 0x1c9   : > { %p1631_p10 = pneg %p1630_p6 }
 0x1ca   : > { %p1637_p1 = por %p1636_p0, %p1635_p9 }
 0x1cc   : > { %p1638_p4 = pnand %p1637_p1, %p1631_p10 }
 0x1ce   : > { %1641 = shalt.err (!%p1638_p4)
}
 0x1cf   : > { %1371 = dma.vmem_to_hbm [thread:$0]  (%p1982_p3), %s822_s21, 128, %s2134_s15, %s792_s27  }
 0x1d0   : > { %s1642_s19 = scalar_lea.vmem %s2101_s12, 128  ;;  %s1783_s25 = smov [#allocation13]  }
 0x1d1   : > { %p1643_p8 = scmp.ne.s32.totalorder %s2101_s12, %s1642_s19  ;;  %s1646_s13 = sshll.u32 %s1783_s25, 4  ;;  %s1647_s13 = int_to_ptr.vmem [resolvable:$false] %s1646_s13 }
 0x1d2   : > { %s1648_s18 = scalar_lea.vmem %s1647_s13, 256  ;;  %p1649_p7 = scmp.lt.s32.totalorder %s2101_s12, %s1647_s13 }
 0x1d3   : > { %p1644_p2 = pnand %p1643_p8, %p1982_p3  ;;  %p1650_p13 = scmp.lt.s32.totalorder %s1648_s18, %s1642_s19 }
 0x1d5   : > { %p1645_p12 = pneg %p1644_p2  ;;  %p1651_p6 = por %p1650_p13, %p1649_p7 }
 0x1d7   : > { %p1652_p10 = pnand %p1651_p6, %p1645_p12 }
 0x1d9   : > { %1655 = shalt.err (!%p1652_p10)
}
 0x1da   : > { %s1656_s15 = scalar_lea.hbm %s2142_s14, 128  ;;  %s1660_s30 = scalar_lea.hbm %s2251_s7, 256 }
 0x1db   : > { %p1657_p11 = scmp.ne.s32.totalorder %s2142_s14, %s1656_s15  ;;  %p1661_p0 = scmp.lt.u32.totalorder %s2142_s14, %s2251_s7 }
 0x1dc   : > { %p1662_p1 = scmp.lt.u32.totalorder %s1660_s30, %s1656_s15  ;;  %p1664_p8 = scmp.lt.u32.totalorder %s1656_s15, %s2142_s14 }
 0x1dd   : > { %p1658_p5 = pnand %p1657_p11, %p1982_p3 }
 0x1de   : > { %p1663_p4 = por %p1662_p1, %p1661_p0 }
 0x1df   : > { %p1659_p9 = pneg %p1658_p5 }
 0x1e0   : > { %p1665_p2 = por %p1664_p8, %p1663_p4 }
 0x1e2   : > { %p1666_p12 = pnand %p1665_p2, %p1659_p9 }
 0x1e4   : > { %1669 = shalt.err (!%p1666_p12)
}
 0x1e5   : > { %1373 = dma.vmem_to_hbm [thread:$0]  (%p1982_p3), %s2101_s12, 128, %s2142_s14, %s2111_s24   ;;  %v1086_v5 = vld [vmem:[%s2248_s4] ss:$0 sm:$0xff] }
 0x1e6   : > { %s415_s25 = scalar_lea.vmem [#allocation14], %s2038_s8  ;;  %s2282_s21 = sld [smem:[#allocation25_spill]] }
 0x1e7   : > { %s863_s13 = sshll.u32 %s415_s25, 4  ;;  %s807_s12 = scalar_lea.sflag [#allocation15], %s2035_s26  ;;  %s2195_s13 = int_to_ptr.vmem [resolvable:$true] %s863_s13 }
 0x1e8   : > { %s1670_s24 = scalar_lea.vmem %s2195_s13, 128  ;;  %s1784_s8 = smov [#allocation14]  }
 0x1e9   : > { %p1671_p7 = scmp.ne.s32.totalorder %s2195_s13, %s1670_s24  ;;  %s1674_s14 = sshll.u32 %s1784_s8, 4  ;;  %s1675_s14 = int_to_ptr.vmem [resolvable:$false] %s1674_s14 }
 0x1ea   : > { %s1676_s30 = scalar_lea.vmem %s1675_s14, 256  ;;  %p1677_p10 = scmp.lt.s32.totalorder %s2195_s13, %s1675_s14 }
 0x1eb   : > { %p1672_p13 = pnand %p1671_p7, %p1982_p3  ;;  %p1678_p11 = scmp.lt.s32.totalorder %s1676_s30, %s1670_s24 }
 0x1ec   : > { %s2193_s27 = scalar_lea.hbm %s2282_s21, %s2105_s16 }
 0x1ed   : > { %p1673_p6 = pneg %p1672_p13  ;;  %p1679_p5 = por %p1678_p11, %p1677_p10 }
 0x1ef   : > { %p1680_p9 = pnand %p1679_p5, %p1673_p6 }
 0x25d   : > { %v778_v4 = vpop.f32.mrb[2].mxu1 }
 0x25e   : > { %v779_v6 = vadd.f32 %v778_v4, %v2097_v3  ;;  %v1252_v7 = vpop.f32.mrb[3].mxu1 }
 0x260   : > { %v789_v8 = vadd.f32 %v1086_v5, %v779_v6 }
 0x262   : > { %790 = vst [vmem:[%s415_s25] sm:$0xff] %v789_v8 }
 0x263   : > { %1683 = shalt.err (!%p1680_p9)
}
 0x264   : > { %s1684_s26 = scalar_lea.hbm %s2193_s27, 128  ;;  %s1688_s20 = scalar_lea.hbm %s2282_s21, 256 }
 0x265   : > { %p1685_p0 = scmp.ne.s32.totalorder %s2193_s27, %s1684_s26  ;;  %p1689_p8 = scmp.lt.u32.totalorder %s2193_s27, %s2282_s21 }
 0x266   : > { %p1690_p2 = scmp.lt.u32.totalorder %s1688_s20, %s1684_s26  ;;  %p1692_p7 = scmp.lt.u32.totalorder %s1684_s26, %s2193_s27 }
 0x267   : > { %p1686_p1 = pnand %p1685_p0, %p1982_p3 }
 0x268   : > { %p1691_p12 = por %p1690_p2, %p1689_p8 }
 0x269   : > { %p1687_p4 = pneg %p1686_p1 }
 0x26a   : > { %p1693_p13 = por %p1692_p7, %p1691_p12 }
 0x26c   : > { %p1694_p6 = pnand %p1693_p13, %p1687_p4 }
 0x26e   : > { %1697 = shalt.err (!%p1694_p6)
}
 0x26f   : > { %1374 = dma.vmem_to_hbm [thread:$0]  (%p1982_p3), %s2195_s13, 128, %s2193_s27, %s807_s12  }
 0x270 PF: > { %s2283_s25 = sld [smem:[#allocation22_spill]]  ;;  %s2284_s18 = sld [smem:[#allocation23_spill]] }
 0x271   : > { %p2286_p11 = scmp.ge.s32.totalorder %s1768_s10, 2 }
 0x276   : > { %s875_s15 = sand.u32 1, %s2283_s25   ;;  %p2285_p10 = scmp.ne.s32.totalorder %s2284_s18, 0 }
 0x277   : > { %s876_s24 = scalar_lea.sflag [#allocation4], %s875_s15 }
 0x278   : > { %p1394_p5 = pnand %p2286_p11, %p2285_p10 }
 0x27a   : > { %1735 = dma.done.wait (!%p1394_p5), %s876_s24, 128  }
 0x27b   : > { %1737 = vsyncadd (!%p1394_p5), %s876_s24, 4294967168  ;;  %s2287_s8 = sadd.s32 4294967294, %s1768_s10  }
 0x27c   : > { %s884_s14 = sand.u32 1, %s2287_s8  }
 0x27d   : > { %s885_s30 = scalar_lea.sflag [#allocation12], %s884_s14 }
 0x27e   : > { %1739 = dma.done.wait (!%p1394_p5), %s885_s30, 256  }
 0x27f   : > { %1741 = vsyncadd (!%p1394_p5), %s885_s30, 4294967040  ;;  %s903_s22 = scalar_lea.sflag [#allocation15], %s875_s15 }
 0x280   : > { %1743 = dma.done.wait (!%p1394_p5), %s903_s22, 128  }
 0x281   : > { %1745 = vsyncadd (!%p1394_p5), %s903_s22, 4294967168  ;;  %s33_s10 = sadd.s32 1, %s1768_s10   ;;  %s2288_s27 = smov %s1752_s28 }
 0x282   : > { %p30_p3 = scmp.ge.s32.totalorder %s33_s10, 4   ;;  %s2289_s28 = smov %s1756_s29 }
 0x283   : > { %s2290_s29 = smov %s1991_s23  ;;  %s2291_s30 = smov %s1764_s9 }
 0x284   : > { %s2292_s9 = smov %s2294_s1  ;;  %32 = sbr.rel (!%p30_p3) target bundleno = 15 (0xf), region = 146 }
 0x28b   :  { %908 = vsyncpa [#allocation3], 1 }
 0x28c   :  { %910 = vsyncpa [#allocation3 + $0x1], 1 }
 0x28d   :  { %911 = vsyncpa [#allocation6], 1 }
 0x28e   :  { %912 = vsyncpa [#allocation9], 1 }
 0x28f   :  { %913 = vsyncpa [#allocation4], 1 }
 0x290   :  { %915 = vsyncpa [#allocation4 + $0x1], 1 }
 0x291   :  { %916 = vsyncpa [#allocation12], 1 }
 0x292   :  { %918 = vsyncpa [#allocation12 + $0x1], 1 }
 0x293   :  { %919 = vsyncpa [#allocation15], 1 }
 0x294   :  { %921 = vsyncpa [#allocation15 + $0x1], 1 }

</bundles_post_ra>
